<compile_context>
chip_gen: v7x
topology: tpu7x:2x2x1
jax: 0.10.0
libtpu: 0.0.40
codegen_flags: <defaults>
</compile_context>

<pallas_src>
import functools
import math

import numpy as np
import jax
import jax.numpy as jnp
from jax import lax
from jax.experimental import pallas as pl
from jax.experimental.pallas import tpu as pltpu


# ---------------------------------------------------------------------------
# Exact PyTorch bicubic (upsample_bicubic2d, align_corners=False) as a 1-D matrix.
# ---------------------------------------------------------------------------
def _cubic_weight(t, A=-0.75):
    at = np.abs(t)
    return np.where(
        at <= 1.0,
        (A + 2.0) * at ** 3 - (A + 3.0) * at ** 2 + 1.0,
        np.where(at < 2.0, A * at ** 3 - 5.0 * A * at ** 2 + 8.0 * A * at - 4.0 * A, 0.0),
    )


def bicubic_matrix(in_size: int, out_size: int) -> np.ndarray:
    """W [out, in] such that W @ x == F.interpolate(x, out, mode='bicubic') along one axis."""
    W = np.zeros((out_size, in_size), dtype=np.float64)
    scale = in_size / out_size
    for i in range(out_size):
        src = (i + 0.5) * scale - 0.5
        i0 = int(math.floor(src))
        t = src - i0
        for k in range(-1, 3):
            idx = min(max(i0 + k, 0), in_size - 1)
            W[i, idx] += _cubic_weight(k - t)
    return W.astype(np.float32)


def _round_up(x: int, m: int) -> int:
    return ((x + m - 1) // m) * m


def _c_chunk(C: int) -> int:
    """Channel chunk for the VPU contraction (bounds the live product temporary)."""
    if C <= 128:
        return C
    for ch in (128, 64, 32, 16, 8):
        if C % ch == 0:
            return ch
    return C


def _tile_vmem_bytes(tb: int, C: int, EE: int, R: int) -> int:
    """Approx. double-buffered per-step VMEM footprint (f32, (8,128)-padded tiles)."""
    feat = tb * _round_up(C, 8) * _round_up(EE, 128) * 4
    seg = tb * _round_up(R, 8) * _round_up(R, 128) * 4
    return 2 * (feat + 2 * seg)  # feat + seg + out, each double-buffered


def _choose_batch_tile(B: int, C: int, EE: int, R: int,
                       max_tile: int = 8,
                       vmem_budget: int = 40 * 1024 * 1024) -> int:
    """Largest divisor of B that fits the VMEM budget and keeps grid >= 2 so the batch
    axis can shard across v7x's two TensorCores (no effect on 1-TC v5e/v6e)."""
    cap = 1 if B == 1 else min(max_tile, max(1, B // 2))
    best = 1
    for t in range(1, cap + 1):
        if B % t:
            continue
        if _tile_vmem_bytes(t, C, EE, R) <= vmem_budget:
            best = t
    return best


# ---------------------------------------------------------------------------
# Pallas kernel: one grid step per batch tile of TB samples.
# ---------------------------------------------------------------------------
def _acl_refine_kernel(emb_ref, feat_ref, seg_ref, wr_ref, wrt_ref, out_ref, *, c_chunk):
    # emb_ref:  [C, 1]        audio-driven embedding (column; shared across the batch)
    # feat_ref: [TB, C, EE]   MaskCLIP spatial features, trailing dims flattened (lane-dense)
    # seg_ref:  [TB, R, R]    CLIPSeg decoder logits
    # wr_ref:   [R, E]        1-D bicubic interpolation matrix
    # wrt_ref:  [E, R]        its transpose (precomputed host-side)
    # out_ref:  [TB, R, R]    refined heatmap
    TB, C, EE = feat_ref.shape
    R, E = wr_ref.shape

    wr = wr_ref[...]      # loaded once, reused for every sample (no broadcast copies)
    wrt = wrt_ref[...]

    # ---- attention score: contract channels on the VPU, chunked over C so the padded
    # ---- product temporary never exceeds TB * c_chunk * EE floats.
    if c_chunk >= C:
        att = jnp.sum(feat_ref[...] * emb_ref[...][None, :, :], axis=1)        # [TB, EE]
    else:
        n_chunks = C // c_chunk

        def body(c, acc):
            start = pl.multiple_of(c * c_chunk, c_chunk)
            f = feat_ref[:, pl.ds(start, c_chunk), :]                           # [TB, CH, EE]
            e = emb_ref[pl.ds(start, c_chunk), :]                               # [CH, 1]
            return acc + jnp.sum(f * e[None, :, :], axis=1)                     # [TB, EE]

        att = lax.fori_loop(0, n_chunks, body,
                            jnp.zeros((TB, EE), jnp.float32), unroll=True)

    # ---- unflatten the E*E lane dim into rows (sublane) x cols (lane) with static lane
    # ---- slices + stack (avoids a minor-dim reshape, which Mosaic may not lower).
    att3 = jnp.stack([att[:, i * E:(i + 1) * E] for i in range(E)], axis=1)     # [TB, E, E]

    # ---- separable bicubic upsample E x E -> R x R: two plain 2-D MXU matmuls per sample.
    ups = []
    for s in range(TB):
        t = jnp.dot(att3[s], wrt, preferred_element_type=jnp.float32)           # [E, R]
        ups.append(jnp.dot(wr, t, preferred_element_type=jnp.float32))          # [R, R]
    up = jnp.stack(ups, axis=0)                                                 # [TB, R, R]

    seg = seg_ref[...]                                                          # [TB, R, R]

    # ---- per-sample amin/amax (lane reduce, then sublane reduce).
    i_min = jnp.min(jnp.min(up, axis=2, keepdims=True), axis=1, keepdims=True)  # [TB,1,1]
    i_max = jnp.max(jnp.max(up, axis=2, keepdims=True), axis=1, keepdims=True)
    a = jnp.min(jnp.min(seg, axis=2, keepdims=True), axis=1, keepdims=True)
    b = jnp.max(jnp.max(seg, axis=2, keepdims=True), axis=1, keepdims=True)

    # Hoist the divide: TB scalar divides instead of TB*R*R per-element divides.
    scale = (b - a) / (i_max - i_min)
    att_norm = a + scale * (up - i_min)
    refined = (seg + att_norm) * 0.5
    # TODO(synk): ImageMasker(10.0, 14.0, 1.0) source not in the snippet; infer path
    # approximated as sigmoid(logits).
    out_ref[...] = jax.nn.sigmoid(refined)


def acl_forward_ideas(seg_logit, spatial_feat, embedding):
    """seg_logit [B,1,R,R] f32, spatial_feat [B,C,E,E] f32, embedding [1,C] f32 -> heatmap [B,1,R,R]."""
    B, one, R, R2 = seg_logit.shape
    assert one == 1 and R == R2
    Bf, C, E, E2 = spatial_feat.shape
    assert Bf == B and E == E2 and embedding.shape == (1, C)
    EE = E * E

    TB = _choose_batch_tile(B, C, EE, R)
    grid = B // TB

    # Free, contiguous layout changes done host-side:
    feat_flat = spatial_feat.reshape(B, C, EE)       # lane-dense feat tiles (EE on lanes)
    seg3 = seg_logit.reshape(B, R, R)
    emb_col = embedding.reshape(C, 1)                # [1,C] -> [C,1], same element order

    Wr = bicubic_matrix(E, R)                        # [R, E]
    wr = jnp.asarray(Wr)
    wrt = jnp.asarray(np.ascontiguousarray(Wr.T))    # [E, R]

    kernel = functools.partial(_acl_refine_kernel, c_chunk=_c_chunk(C))

    # Explicit VMEM budgeting only when tiles are actually big (production CLIPSeg sizes);
    # small problems keep the per-generation scoped defaults.
    cp_kwargs = dict(dimension_semantics=("parallel",))
    if _tile_vmem_bytes(TB, C, EE, R) > 12 * 1024 * 1024:
        cp_kwargs["vmem_limit_bytes"] = 48 * 1024 * 1024   # below v7x's 64 MiB physical VMEM

    out = pl.pallas_call(
        kernel,
        out_shape=jax.ShapeDtypeStruct((B, R, R), jnp.float32),
        grid_spec=pltpu.PrefetchScalarGridSpec(
            num_scalar_prefetch=0,
            grid=(grid,),
            in_specs=[
                pl.BlockSpec((C, 1), lambda g: (0, 0)),          # embedding (resident)
                pl.BlockSpec((TB, C, EE), lambda g: (g, 0, 0)),  # spatial features
                pl.BlockSpec((TB, R, R), lambda g: (g, 0, 0)),   # seg logits
                pl.BlockSpec((R, E), lambda g: (0, 0)),          # Wr (resident)
                pl.BlockSpec((E, R), lambda g: (0, 0)),          # Wr^T (resident)
            ],
            out_specs=pl.BlockSpec((TB, R, R), lambda g: (g, 0, 0)),
        ),
        compiler_params=pltpu.CompilerParams(**cp_kwargs),
    )(emb_col, feat_flat, seg3, wr, wrt)
    return out.reshape(B, 1, R, R)


# ---------------------------------------------------------------------------
# Pure-JAX reference of the same math (for a correctness check).
# ---------------------------------------------------------------------------
def _reference(seg_logit, spatial_feat, embedding):
    B, _, R, _ = seg_logit.shape
    _, C, E, _ = spatial_feat.shape
    emb = jnp.broadcast_to(embedding[None], (B, 1, C))                    # .unsqueeze(0).repeat(B,1,1)
    att = jnp.einsum("bnc,bcj->bnj", emb, spatial_feat.reshape(B, C, E * E))
    att = att.reshape(B, 1, E, E)
    Wr = jnp.asarray(bicubic_matrix(E, R))
    up = jnp.einsum("ri,bnij,sj->bnrs", Wr, att, Wr)                      # bicubic interp
    i_min = up.min(axis=(1, 2, 3), keepdims=True)
    i_max = up.max(axis=(1, 2, 3), keepdims=True)
    a = seg_logit.min(axis=(1, 2, 3), keepdims=True)
    b = seg_logit.max(axis=(1, 2, 3), keepdims=True)
    att_norm = a + (b - a) * (up - i_min) / (i_max - i_min)
    refined = (seg_logit + att_norm) * 0.5
    return jax.nn.sigmoid(refined)


if __name__ == "__main__":
    B, C, E, R = 2, 32, 8, 16  # batch, feature channels, feature map size, output resolution
    key = jax.random.PRNGKey(0)
    k1, k2, k3 = jax.random.split(key, 3)
    seg_logit = jax.random.normal(k1, (B, 1, R, R), jnp.float32)        # stand-in CLIPSeg decoder logits
    spatial_feat = jax.random.normal(k2, (B, C, E, E), jnp.float32)     # stand-in MaskCLIP pixel features
    embedding = jax.random.normal(k3, (1, C), jnp.float32)              # stand-in audio-driven embedding

    heatmap = acl_forward_ideas(seg_logit, spatial_feat, embedding)
    jax.block_until_ready(heatmap)

    ref = _reference(seg_logit, spatial_feat, embedding)
    assert heatmap.shape == (B, 1, R, R)
    err = float(jnp.abs(heatmap - ref).max())
    assert err < 1e-4, err
    print("KERNEL_OK")
</pallas_src>

<mosaic_0001>
module attributes {stable_mosaic.version = 11 : i64} {
  func.func @_acl_refine_kernel(%arg0: i32, %arg1: memref<32x1xf32, #tpu.memory_space<vmem>>, %arg2: memref<1x32x64xf32, #tpu.memory_space<vmem>>, %arg3: memref<1x16x16xf32, #tpu.memory_space<vmem>>, %arg4: memref<16x8xf32, #tpu.memory_space<vmem>>, %arg5: memref<8x16xf32, #tpu.memory_space<vmem>>, %arg6: memref<1x16x16xf32, #tpu.memory_space<vmem>>) attributes {dimension_semantics = [#tpu.dimension_semantics<parallel>], iteration_bounds = array<i64: 2>, scalar_prefetch = 0 : i64, scratch_operands = 0 : i64, tpu.core_type = #tpu.core_type<tc>, window_params = [{pipeline_mode = #tpu.pipeline_mode<synchronous>, transform_indices = @transform_0, window_bounds = array<i64: 32, 1>}, {transform_indices = @transform_1, window_bounds = array<i64: 1, 32, 64>}, {transform_indices = @transform_2, window_bounds = array<i64: 1, 16, 16>}, {pipeline_mode = #tpu.pipeline_mode<synchronous>, transform_indices = @transform_3, window_bounds = array<i64: 16, 8>}, {pipeline_mode = #tpu.pipeline_mode<synchronous>, transform_indices = @transform_4, window_bounds = array<i64: 8, 16>}, {transform_indices = @transform_5, window_bounds = array<i64: 1, 16, 16>}]} {
    %c0 = arith.constant 0 : index
    %c0_0 = arith.constant 0 : index
    %0 = vector.load %arg4[%c0, %c0_0] : memref<16x8xf32, #tpu.memory_space<vmem>>, vector<16x8xf32>
    %c0_1 = arith.constant 0 : index
    %c0_2 = arith.constant 0 : index
    %1 = vector.load %arg5[%c0_1, %c0_2] : memref<8x16xf32, #tpu.memory_space<vmem>>, vector<8x16xf32>
    %c0_3 = arith.constant 0 : index
    %c0_4 = arith.constant 0 : index
    %c0_5 = arith.constant 0 : index
    %2 = vector.load %arg2[%c0_3, %c0_4, %c0_5] : memref<1x32x64xf32, #tpu.memory_space<vmem>>, vector<1x32x64xf32>
    %c0_6 = arith.constant 0 : index
    %c0_7 = arith.constant 0 : index
    %3 = vector.load %arg1[%c0_6, %c0_7] : memref<32x1xf32, #tpu.memory_space<vmem>>, vector<32x1xf32>
    %4 = vector.shape_cast %3 : vector<32x1xf32> to vector<1x32x1xf32>
    %5 = vector.broadcast %4 : vector<1x32x1xf32> to vector<1x32x64xf32>
    %6 = arith.mulf %2, %5 : vector<1x32x64xf32>
    %cst = arith.constant dense<0.000000e+00> : vector<1x64xf32>
    %7 = vector.multi_reduction <add>, %6, %cst [1] : vector<1x32x64xf32> to vector<1x64xf32>
    %8 = vector.extract_strided_slice %7 {offsets = [0, 0], sizes = [1, 8], strides = [1, 1]} : vector<1x64xf32> to vector<1x8xf32>
    %9 = vector.extract_strided_slice %7 {offsets = [0, 8], sizes = [1, 8], strides = [1, 1]} : vector<1x64xf32> to vector<1x8xf32>
    %10 = vector.extract_strided_slice %7 {offsets = [0, 16], sizes = [1, 8], strides = [1, 1]} : vector<1x64xf32> to vector<1x8xf32>
    %11 = vector.extract_strided_slice %7 {offsets = [0, 24], sizes = [1, 8], strides = [1, 1]} : vector<1x64xf32> to vector<1x8xf32>
    %12 = vector.extract_strided_slice %7 {offsets = [0, 32], sizes = [1, 8], strides = [1, 1]} : vector<1x64xf32> to vector<1x8xf32>
    %13 = vector.extract_strided_slice %7 {offsets = [0, 40], sizes = [1, 8], strides = [1, 1]} : vector<1x64xf32> to vector<1x8xf32>
    %14 = vector.extract_strided_slice %7 {offsets = [0, 48], sizes = [1, 8], strides = [1, 1]} : vector<1x64xf32> to vector<1x8xf32>
    %15 = vector.extract_strided_slice %7 {offsets = [0, 56], sizes = [1, 8], strides = [1, 1]} : vector<1x64xf32> to vector<1x8xf32>
    %16 = vector.shape_cast %8 : vector<1x8xf32> to vector<1x1x8xf32>
    %17 = vector.shape_cast %9 : vector<1x8xf32> to vector<1x1x8xf32>
    %18 = vector.shape_cast %10 : vector<1x8xf32> to vector<1x1x8xf32>
    %19 = vector.shape_cast %11 : vector<1x8xf32> to vector<1x1x8xf32>
    %20 = vector.shape_cast %12 : vector<1x8xf32> to vector<1x1x8xf32>
    %21 = vector.shape_cast %13 : vector<1x8xf32> to vector<1x1x8xf32>
    %22 = vector.shape_cast %14 : vector<1x8xf32> to vector<1x1x8xf32>
    %23 = vector.shape_cast %15 : vector<1x8xf32> to vector<1x1x8xf32>
    %24 = tpu.concatenate %16, %17, %18, %19, %20, %21, %22, %23 in 1 : vector<1x1x8xf32>, vector<1x1x8xf32>, vector<1x1x8xf32>, vector<1x1x8xf32>, vector<1x1x8xf32>, vector<1x1x8xf32>, vector<1x1x8xf32>, vector<1x1x8xf32> -> vector<1x8x8xf32>
    %25 = vector.shape_cast %24 : vector<1x8x8xf32> to vector<8x8xf32>
    %cst_8 = arith.constant dense<0.000000e+00> : vector<8x16xf32>
    %26 = tpu.matmul %25, %1, %cst_8 {dimension_numbers = #tpu.dot_dimension_numbers<[1], [0], [0], [1], [0, 0, 1, 1], [], []>} : vector<8x8xf32>, vector<8x16xf32>, vector<8x16xf32> -> vector<8x16xf32>
    %cst_9 = arith.constant dense<0.000000e+00> : vector<16x16xf32>
    %27 = tpu.matmul %0, %26, %cst_9 {dimension_numbers = #tpu.dot_dimension_numbers<[1], [0], [0], [1], [0, 0, 1, 1], [], []>} : vector<16x8xf32>, vector<8x16xf32>, vector<16x16xf32> -> vector<16x16xf32>
    %28 = vector.shape_cast %27 : vector<16x16xf32> to vector<1x16x16xf32>
    %c0_10 = arith.constant 0 : index
    %c0_11 = arith.constant 0 : index
    %c0_12 = arith.constant 0 : index
    %29 = vector.load %arg3[%c0_10, %c0_11, %c0_12] : memref<1x16x16xf32, #tpu.memory_space<vmem>>, vector<1x16x16xf32>
    %cst_13 = arith.constant dense<0x7F800000> : vector<1x16xf32>
    %30 = vector.multi_reduction <minimumf>, %28, %cst_13 [2] : vector<1x16x16xf32> to vector<1x16xf32>
    %31 = vector.shape_cast %30 : vector<1x16xf32> to vector<1x16x1xf32>
    %cst_14 = arith.constant dense<0x7F800000> : vector<1x1xf32>
    %32 = vector.multi_reduction <minimumf>, %31, %cst_14 [1] : vector<1x16x1xf32> to vector<1x1xf32>
    %33 = vector.shape_cast %32 : vector<1x1xf32> to vector<1x1x1xf32>
    %cst_15 = arith.constant dense<0xFF800000> : vector<1x16xf32>
    %34 = vector.multi_reduction <maximumf>, %28, %cst_15 [2] : vector<1x16x16xf32> to vector<1x16xf32>
    %35 = vector.shape_cast %34 : vector<1x16xf32> to vector<1x16x1xf32>
    %cst_16 = arith.constant dense<0xFF800000> : vector<1x1xf32>
    %36 = vector.multi_reduction <maximumf>, %35, %cst_16 [1] : vector<1x16x1xf32> to vector<1x1xf32>
    %37 = vector.shape_cast %36 : vector<1x1xf32> to vector<1x1x1xf32>
    %cst_17 = arith.constant dense<0x7F800000> : vector<1x16xf32>
    %38 = vector.multi_reduction <minimumf>, %29, %cst_17 [2] : vector<1x16x16xf32> to vector<1x16xf32>
    %39 = vector.shape_cast %38 : vector<1x16xf32> to vector<1x16x1xf32>
    %cst_18 = arith.constant dense<0x7F800000> : vector<1x1xf32>
    %40 = vector.multi_reduction <minimumf>, %39, %cst_18 [1] : vector<1x16x1xf32> to vector<1x1xf32>
    %41 = vector.shape_cast %40 : vector<1x1xf32> to vector<1x1x1xf32>
    %cst_19 = arith.constant dense<0xFF800000> : vector<1x16xf32>
    %42 = vector.multi_reduction <maximumf>, %29, %cst_19 [2] : vector<1x16x16xf32> to vector<1x16xf32>
    %43 = vector.shape_cast %42 : vector<1x16xf32> to vector<1x16x1xf32>
    %cst_20 = arith.constant dense<0xFF800000> : vector<1x1xf32>
    %44 = vector.multi_reduction <maximumf>, %43, %cst_20 [1] : vector<1x16x1xf32> to vector<1x1xf32>
    %45 = vector.shape_cast %44 : vector<1x1xf32> to vector<1x1x1xf32>
    %46 = arith.subf %45, %41 : vector<1x1x1xf32>
    %47 = arith.subf %37, %33 : vector<1x1x1xf32>
    %48 = arith.divf %46, %47 : vector<1x1x1xf32>
    %49 = vector.broadcast %33 : vector<1x1x1xf32> to vector<1x16x16xf32>
    %50 = arith.subf %28, %49 : vector<1x16x16xf32>
    %51 = vector.broadcast %48 : vector<1x1x1xf32> to vector<1x16x16xf32>
    %52 = arith.mulf %51, %50 : vector<1x16x16xf32>
    %53 = vector.broadcast %41 : vector<1x1x1xf32> to vector<1x16x16xf32>
    %54 = arith.addf %53, %52 : vector<1x16x16xf32>
    %55 = arith.addf %29, %54 : vector<1x16x16xf32>
    %cst_21 = arith.constant 5.000000e-01 : f32
    %56 = vector.broadcast %cst_21 : f32 to vector<1x16x16xf32>
    %57 = arith.mulf %55, %56 : vector<1x16x16xf32>
    %58 = arith.negf %57 : vector<1x16x16xf32>
    %59 = math.exp %58 : vector<1x16x16xf32>
    %cst_22 = arith.constant 1.000000e+00 : f32
    %60 = vector.broadcast %cst_22 : f32 to vector<1x16x16xf32>
    %61 = arith.addf %60, %59 : vector<1x16x16xf32>
    %62 = arith.divf %60, %61 : vector<1x16x16xf32>
    %c0_23 = arith.constant 0 : index
    %c0_24 = arith.constant 0 : index
    %c0_25 = arith.constant 0 : index
    %63 = vector.load %arg6[%c0_23, %c0_24, %c0_25] : memref<1x16x16xf32, #tpu.memory_space<vmem>>, vector<1x16x16xf32>
    tpu.vector_store %arg6[%c0_23, %c0_24, %c0_25], %62 {strides = array<i32>} : memref<1x16x16xf32, #tpu.memory_space<vmem>>, vector<1x16x16xf32>,
    return
  }
  func.func @transform_0(%arg0: i32) -> (i32, i32) {
    %c0_i32 = arith.constant 0 : i32
    %c0_i32_0 = arith.constant 0 : i32
    %c0_i32_1 = arith.constant 0 : i32
    return %c0_i32, %c0_i32_0 : i32, i32
  }
  func.func @transform_1(%arg0: i32) -> (i32, i32, i32) {
    %c0_i32 = arith.constant 0 : i32
    %c0_i32_0 = arith.constant 0 : i32
    %c0_i32_1 = arith.constant 0 : i32
    return %arg0, %c0_i32, %c0_i32_0 : i32, i32, i32
  }
  func.func @transform_2(%arg0: i32) -> (i32, i32, i32) {
    %c0_i32 = arith.constant 0 : i32
    %c0_i32_0 = arith.constant 0 : i32
    %c0_i32_1 = arith.constant 0 : i32
    return %arg0, %c0_i32, %c0_i32_0 : i32, i32, i32
  }
  func.func @transform_3(%arg0: i32) -> (i32, i32) {
    %c0_i32 = arith.constant 0 : i32
    %c0_i32_0 = arith.constant 0 : i32
    %c0_i32_1 = arith.constant 0 : i32
    return %c0_i32, %c0_i32_0 : i32, i32
  }
  func.func @transform_4(%arg0: i32) -> (i32, i32) {
    %c0_i32 = arith.constant 0 : i32
    %c0_i32_0 = arith.constant 0 : i32
    %c0_i32_1 = arith.constant 0 : i32
    return %c0_i32, %c0_i32_0 : i32, i32
  }
  func.func @transform_5(%arg0: i32) -> (i32, i32, i32) {
    %c0_i32 = arith.constant 0 : i32
    %c0_i32_0 = arith.constant 0 : i32
    %c0_i32_1 = arith.constant 0 : i32
    return %arg0, %c0_i32, %c0_i32_0 : i32, i32, i32
  }
}

</mosaic_0001>

<bundles_post_ra>
// kernel: tpu_custom_call.1
= control target key start
LH: loop header
LB: loop body
LE: loop exit
PB: predicated region body
PF: predicated region fallthrough
CT: control target
= control target key end

     0   :  { %10 = vsyncpa [#allocation3], 0  ;;  %s1149_s0 = inlined_call_operand.vmem [shape: f32[32,1], index: 0, kind: input, shape index: {}]   ;;  %s1150_s1 = inlined_call_operand.hbm [shape: f32[2,32,64], index: 1, kind: input, shape index: {}]   ;;  %s1151_s2 = inlined_call_operand.vmem [shape: f32[2,16,16], index: 2, kind: input, shape index: {}]   ;;  %s1152_s3 = inlined_call_operand.vmem [shape: f32[16,8], index: 3, kind: input, shape index: {}]   ;;  %s1153_s4 = inlined_call_operand.vmem [shape: f32[8,16], index: 4, kind: input, shape index: {}]   ;;  %s1154_s5 = inlined_call_operand.hbm [shape: f32[2,16,16], index: 5, kind: output, shape index: {}]  }
   0x1   :  { %12 = vsyncpa [#allocation3 + $0x1], 0 }
   0x2   :  { %13 = vsyncpa [#allocation4], 0 }
   0x3   :  { %15 = vsyncpa [#allocation4 + $0x1], 0  ;;  %s940_s18 = smov 0   ;;  %s942_s19 = smov 0  }
   0x4   :  { %s944_s20 = smov 0   ;;  %s946_s21 = smov 0  }
   0x5 LB: > { %s961_s22 = sadd.s32 4294967295, %s892_s21   ;;  %s685_s23 = sadd.s32 4294967294, %s892_s21   ;;  %s892_s21 = sphi %s946_s21, %s1167_s21   ;;  %s888_s20 = sphi %s944_s20, %s1166_s20   ;;  %s884_s19 = sphi %s942_s19, %s1165_s19   ;;  %s880_s18 = sphi %s940_s18, %s1164_s18  }
   0x6   : > { %s965_s24 = sadd.s32 1, %s892_s21   ;;  %s49_s25 = sadd.s32 1, %s888_s20 }
   0x7   : > { %s46_s26 = ssub.s32 %s892_s21, %s965_s24  ;;  %p56_p0 = scmp.ne.s32.totalorder %s888_s20, %s884_s19 }
   0x8   : > { %p47_p1 = scmp.eq.s32.totalorder %s46_s26, 0  ;;  %p57_p2 = scmp.eq.s32.totalorder %s892_s21, 0 }
   0x9   : > { %p62_p3 = scmp.ne.s32.totalorder %s884_s19, %s880_s18  ;;  %p63_p4 = scmp.eq.s32.totalorder %s961_s22, 0 }
   0xa   : > { %s977_s27 = scalar_select %p47_p1, %s888_s20, %s49_s25  }
   0xb   : > { %p979_p5 = por %p57_p2, %p56_p0  ;;  %p983_p6 = por %p63_p4, %p62_p3 }
   0xc   : > { %p154_p7 = scmp.eq.s32.totalorder %s961_s22, 1  ;;  %p160_p8 = scmp.eq.s32.totalorder %s685_s23, 1 }
   0xd   : > { %p736_p10 = scmp.lt.s32.totalorder %s892_s21, 2  ;;  %s189_s7 = sand.u32 1, %s888_s20  }
   0xe   : > { %p990_p11 = por %p154_p7, %p56_p0  ;;  %p994_p12 = por %p160_p8, %p62_p3 }
   0xf   : > { %s706_s8 = sshll.u32 %s892_s21, 9  ;;  %s688_s9 = sshll.u32 %s189_s7, 5 }
  0x10   : > { %s1158_s30 = scalar_select %p990_p11, 1, 0 }
  0x11   : > { %s1159_s6 = scalar_select %p994_p12, 1, 0 }
  0x12   : > { %s1003_s12 = scalar_lea.hbm %s1150_s1, %s706_s8  ;;  %s193_s13 = scalar_lea.vmem [#allocation2], %s688_s9 }
  0x13   : > { %s200_s14 = sshll.u32 %s193_s13, 4  ;;  %p1007_p13 = pnand %p736_p10, %p979_p5  ;;  %s1011_s14 = int_to_ptr.vmem [resolvable:$true] %s200_s14 }
  0x14   : > { %s1013_s16 = scalar_lea.sflag [#allocation3], %s189_s7  ;;  %s796_s17 = scalar_lea.hbm %s1003_s12, 512 }
  0x15   : > { %p797_p0 = scmp.ne.s32.totalorder %s1003_s12, %s796_s17  ;;  %p798_p1 = pneg %p1007_p13 }
  0x16   : > { %s801_s26 = scalar_lea.hbm %s1150_s1, 1024  ;;  %p802_p4 = scmp.lt.u32.totalorder %s1003_s12, %s1150_s1 }
  0x17   : > { %p799_p2 = pnand %p798_p1, %p797_p0  ;;  %p803_p5 = scmp.lt.u32.totalorder %s801_s26, %s796_s17 }
  0x18   : > { %p805_p8 = scmp.lt.u32.totalorder %s796_s17, %s1003_s12 }
  0x19   : > { %p800_p3 = pneg %p799_p2  ;;  %p804_p7 = por %p803_p5, %p802_p4 }
  0x1b   : > { %p806_p10 = por %p805_p8, %p804_p7 }
  0x1d   : > { %p807_p9 = pnand %p806_p10, %p800_p3 }
  0x1f   : > { %810 = shalt.err (!%p807_p9)
}
  0x20   : > { %s811_s7 = scalar_lea.vmem %s1011_s14, 512  ;;  %s894_s9 = smov [#allocation2]  }
  0x21   : > { %p812_p0 = scmp.ne.s32.totalorder %s1011_s14, %s811_s7  ;;  %s816_s10 = sshll.u32 %s894_s9, 4  ;;  %s817_s10 = int_to_ptr.vmem [resolvable:$false] %s816_s10 }
  0x22   : > { %s818_s11 = scalar_lea.vmem %s817_s10, 1024  ;;  %p819_p11 = scmp.lt.s32.totalorder %s1011_s14, %s817_s10 }
  0x23   : > { %p814_p2 = pnand %p812_p0, %p798_p1  ;;  %p820_p4 = scmp.lt.s32.totalorder %s818_s11, %s811_s7 }
  0x25   : > { %p815_p12 = pneg %p814_p2  ;;  %p821_p5 = por %p820_p4, %p819_p11 }
  0x27   : > { %p822_p7 = pnand %p821_p5, %p815_p12 }
  0x29   : > { %825 = shalt.err (!%p822_p7)
}
  0x2a   : > { %s895_s13 = smov 128   ;;  %s896_s17 = smov 8  }
  0x2b   : > { %731 = dma.hbm_to_vmem [thread:$0]  (!%p1007_p13), %s1003_s12, 512, %s1011_s14, %s1013_s16, %s895_s13, %s895_s13, %s896_s17  }
  0x2c   : > { %p691_p9 = scmp.ge.s32.totalorder %s892_s21, 1  ;;  %p216_p1 = scmp.lt.s32.totalorder %s892_s21, 3 }
  0x2e   : > { %p217_p3 = pnand %p691_p9, %p216_p1 }
  0x2f   : > { %s1044_s23 = sand.u32 (!%p217_p3), 1, %s884_s19  }
  0x30   : > { %220 = sbr.rel (%p217_p3) target bundleno = 992 (0x3e0), region = 40  ;;  %s692_s25 = sshll.u32 (!%p217_p3), %s1044_s23, 5 }
  0x31   : > { %s223_s26 = scalar_lea.sflag (!%p217_p3), [#allocation3], %s1044_s23  ;;  %s226_s28 = scalar_lea.vmem (!%p217_p3), [#allocation2], %s692_s25 }
  0x37   : > { %871 = dma.done.wait (%p983_p6), %s223_s26, 512  }
  0x38   : > { %873 = vsyncadd (%p983_p6), %s223_s26, 4294966784  ;;  %v897_v0 = vmov 0   ;;  %v272_v1 = vld [vmem:[%s1149_s0 + $0x10] sm:$0xff]  ;;  %v270_v2 = vld [vmem:[%s1149_s0] sm:$0xff]  ;;  %vm298_vm0 = vcmask 523264   ;;  %v898_v29 = vmov 0.0  }
  0x39   : > { %785 = vset.pattern.permute.xlu1 %v897_v0  ;;  %784 = vset.pattern.permute.xlu0 %v897_v0  ;;  %v273_v3 = vld [vmem:[%s1149_s0 + $0x18] sm:$0xff]  ;;  %v271_v4 = vld [vmem:[%s1149_s0 + $0x8] sm:$0xff]  ;;  %v266_v7 = vld [vmem:[%s226_s28] sm:$0xff]  ;;  %vm899_vm1 = vmmov 0   ;;  %s900_s13 = smov 112   ;;  %s901_s17 = smov 120  }
  0x3a   : > { %286 = vperm.xlu1 %785, %v272_v1   ;;  %276 = vperm.xlu0 %784, %v270_v2   ;;  %v268_v8 = vld [vmem:[%s226_s28 + $0x10] sm:$0xff]  ;;  %v267_v9 = vld [vmem:[%s226_s28 + $0x8] sm:$0xff]  ;;  %v269_v12 = vld [vmem:[%s226_s28 + $0x18] sm:$0xff]  ;;  %s902_s25 = smov 96   ;;  %s903_s26 = smov 104   ;;  %vm334_vm2 = vcmask 1040384  }
  0x3b   : > { %714 = vmatprep.subr.mxu0 %v898_v29  ;;  %v265_v31 = vld [vmem:[%s1153_s4] sm:$0xff]  ;;  %716 = vmatprep.mubr.msk.f32.mxu0 %vm899_vm1, %v898_v29  ;;  %s904_s28 = smov 80   ;;  %s905_s12 = smov 88   ;;  %vm336_vm3 = vcmask 1041408   ;;  %vm338_vm4 = vcmask 1042432   ;;  %vm340_vm5 = vcmask 1043456  }
  0x3c   : > { %715 = vmatpush3.msra.mxu0 %v265_v31  ;;  %s906_s14 = smov 72   ;;  %vm342_vm6 = vcmask 1044480   ;;  %vm344_vm7 = vcmask 1045504   ;;  %vm346_vm8 = vcmask 1046528   ;;  %vm348_vm9 = vcmask 64512   ;;  %v263_v46 = vld [vmem:[%s1152_s3] sm:$0xff] }
  0x3d   : > { %721 = vmatprep.mubr.msk.f32.mxu1 %vm348_vm9, %v263_v46  ;;  %v264_v48 = vld [vmem:[%s1152_s3 + $0x8] sm:$0xff]  ;;  %p258_p6 = scmp.lt.s32.totalorder %s961_s22, 1  ;;  %vm505_vm10 = vcmask 130048   ;;  %s587_s16 = scalar_lea.sflag [#allocation4], %s1044_s23 }
  0x3e   : > { %291 = vperm.xlu1 %785, %v273_v3   ;;  %281 = vperm.xlu0 %784, %v271_v4   ;;  %p1161_p12 = scmp.ne.s32.totalorder %s1158_s30, 0  ;;  %s907_s8 = smov [#allocation5]  }
  0x3f   : > { %s259_s9 = scalar_select %p258_p6, %s961_s22, 1 }
  0x40   : > { %s830_s7 = sshll.u32 %s907_s8, 4  ;;  %s831_s7 = int_to_ptr.vmem [resolvable:$false] %s830_s7 }
  0x41   : > { %s707_s29 = sshll.u32 %s259_s9, 4  ;;  %s832_s9 = scalar_lea.vmem %s831_s7, 512 }
  0xb9   : > { %v287_v5 = vpop.permute.xlu1 %286  ;;  %v277_v6 = vpop.permute.xlu0 %276 }
  0xba   : > { %v294_v10 = vmul.f32 %v277_v6, %v266_v7  ;;  %v296_v14 = vmul.f32 %v287_v5, %v268_v8 }
  0xbc   : > { %v299_v16 = vsel %vm298_vm0, %v294_v10, 0.0  ;;  %v302_v20 = vsel %vm298_vm0, %v296_v14, 0.0 }
  0xbd   : > { %v292_v11 = vpop.permute.xlu1 %291  ;;  %v282_v13 = vpop.permute.xlu0 %281 }
  0xbe   : > { %v295_v15 = vmul.f32 %v282_v13, %v267_v9  ;;  %v297_v17 = vmul.f32 %v292_v11, %v269_v12 }
  0xc0   : > { %v300_v18 = vsel %vm298_vm0, %v295_v15, 0.0  ;;  %v304_v22 = vsel %vm298_vm0, %v297_v17, 0.0 }
  0xc1   : > { %v301_v19 = vadd.f32 %v300_v18, %v299_v16 }
  0xc3   : > { %v303_v21 = vadd.f32 %v302_v20, %v301_v19 }
  0xc5   : > { %v305_v23 = vadd.f32 %v304_v22, %v303_v21 }
  0xc7   : > { %v306_v24 = vrot.slane %v305_v23, 4 }
  0xc9   : > { %v307_v25 = vadd.f32 %v306_v24, %v305_v23 }
  0xcb   : > { %v308_v26 = vrot.slane %v307_v25, 2 }
  0xcd   : > { %v309_v27 = vadd.f32 %v308_v26, %v307_v25 }
  0xcf   : > { %v310_v28 = vrot.slane %v309_v27, 1 }
  0xd1   : > { %v311_v30 = vadd.f32 %v310_v28, %v309_v27 }
  0xd3   : > { %316 = vrot.lane.b32.xlu1 %v311_v30, %s900_s13  ;;  %313 = vrot.lane.b32.xlu0 %v311_v30, %s901_s17  ;;  %s262_s13 = scalar_lea.vmem %s1151_s2, %s707_s29  ;;  %s693_s17 = sshll.u32 %s1044_s23, 4 }
  0xd4   : > { %v503_v54 = vld [vmem:[%s262_s13] sm:$0xff]  ;;  %v504_v56 = vld [vmem:[%s262_s13 + $0x8] sm:$0xff] }
  0xd5   : > { %v532_v58 = vsel %vm505_vm10, %v503_v54, inf  ;;  %v535_v59 = vsel %vm505_vm10, %v504_v56, inf  ;;  %v545_v60 = vsel %vm505_vm10, %v503_v54, -inf  ;;  %v548_v61 = vsel %vm505_vm10, %v504_v56, -inf }
  0xd7   : > { %322 = vrot.lane.b32.xlu1 %v311_v30, %s902_s25  ;;  %319 = vrot.lane.b32.xlu0 %v311_v30, %s903_s26  ;;  %s708_s25 = sshll.u32 %s961_s22, 8  ;;  %s257_s26 = scalar_lea.vmem [#allocation5], %s693_s17 }
  0xd8   : > { %s1101_s15 = scalar_lea.hbm %s1154_s5, %s708_s25 }
  0xdb   : > { %328 = vrot.lane.b32.xlu1 %v311_v30, %s904_s28  ;;  %325 = vrot.lane.b32.xlu0 %v311_v30, %s905_s12  ;;  %s600_s28 = sshll.u32 %s257_s26, 4  ;;  %s1103_s28 = int_to_ptr.vmem [resolvable:$true] %s600_s28 }
  0xdc   : > { %s826_s22 = scalar_lea.vmem %s1103_s28, 256  ;;  %p833_p10 = scmp.lt.s32.totalorder %s1103_s28, %s831_s7 }
  0xdd   : > { %p827_p11 = scmp.ne.s32.totalorder %s1103_s28, %s826_s22  ;;  %p834_p0 = scmp.lt.s32.totalorder %s832_s9, %s826_s22 }
  0xdf   : > { %331 = vrot.lane.b32.xlu0 %v311_v30, %s906_s14  ;;  %p828_p13 = pnand %p827_p11, %p1161_p12  ;;  %p835_p2 = por %p834_p0, %p833_p10 }
  0xe1   : > { %p829_p8 = pneg %p828_p13 }
  0xe3   : > { %p836_p4 = pnand %p835_p2, %p829_p8 }
 0x145   : > { %v317_v32 = vpop.permute.xlu1 %316  ;;  %v314_v33 = vpop.permute.xlu0 %313 }
 0x146   : > { %v335_v34 = vsel %vm334_vm2, %v311_v30, %v314_v33 }
 0x147   : > { %v337_v36 = vsel %vm336_vm3, %v335_v34, %v317_v32 }
 0x149   : > { %v323_v35 = vpop.permute.xlu1 %322  ;;  %v320_v37 = vpop.permute.xlu0 %319 }
 0x14a   : > { %v339_v38 = vsel %vm338_vm4, %v337_v36, %v320_v37 }
 0x14b   : > { %v341_v39 = vsel %vm340_vm5, %v339_v38, %v323_v35 }
 0x14d   : > { %v326_v40 = vpop.permute.xlu0 %325  ;;  %v329_v41 = vpop.permute.xlu1 %328 }
 0x14e   : > { %v343_v42 = vsel %vm342_vm6, %v341_v39, %v326_v40 }
 0x14f   : > { %v345_v43 = vsel %vm344_vm7, %v343_v42, %v329_v41 }
 0x151   : > { %v332_v44 = vpop.permute.xlu0 %331 }
 0x152   : > { %v347_v45 = vsel %vm346_vm8, %v345_v43, %v332_v44 }
 0x153   : > { %717 = vmatmul.mubr.msk.f32.vlgmr.msra.gmra.mrb[0].mxu0 %vm348_vm9, %v347_v45 }
 0x226   : > { %v418_v47 = vpop.f32.mrb[0].mxu0 }
 0x227   : > { %v718_v49 = vpop.f32.mrb[1].mxu0  ;;  %719 = vmatprep.subr.mxu1 %v418_v47 }
 0x228   : > { %720 = vmatpush3.msra.mxu1 %v418_v47 }
 0x229   : > { %722 = vmatmul.mubr.msk.f32.vlgmr.msra.gmra.mrb[0].mxu1 %vm348_vm9, %v264_v48 }
 0x2fc   : > { %v1075_v50 = vpop.f32.mrb[0].mxu1 }
 0x2fd   : > { %v1077_v51 = vpop.f32.mrb[1].mxu1  ;;  %v509_v52 = vsel %vm505_vm10, %v1075_v50, inf  ;;  %v522_v57 = vsel %vm505_vm10, %v1075_v50, -inf }
 0x2fe   : > { %510 = vmin.xlane.f32.xlu0 %v509_v52  ;;  %v506_v53 = vsel %vm505_vm10, %v1077_v51, inf  ;;  %v519_v55 = vsel %vm505_vm10, %v1077_v51, -inf }
 0x2ff   : > { %507 = vmin.xlane.f32.xlu1 %v506_v53 }
 0x302   : > { %520 = vmax.xlane.f32.xlu0 %v519_v55 }
 0x303   : > { %523 = vmax.xlane.f32.xlu1 %v522_v57 }
 0x306   : > { %533 = vmin.xlane.f32.xlu0 %v532_v58 }
 0x307   : > { %536 = vmin.xlane.f32.xlu1 %v535_v59 }
 0x30a   : > { %546 = vmax.xlane.f32.xlu0 %v545_v60 }
 0x30b   : > { %549 = vmax.xlane.f32.xlu1 %v548_v61 }
 0x38b   : > { %v511_v62 = vpop.xlane.xlu0 %510 }
 0x38c   : > { %v508_v63 = vpop.xlane.xlu1 %507 }
 0x38d   : > { %v512_v0 = vmin.f32 %v508_v63, %v511_v62 }
 0x38f   : > { %v513_v1 = vrot.slane %v512_v0, 4  ;;  %v521_v2 = vpop.xlane.xlu0 %520 }
 0x390   : > { %v524_v3 = vpop.xlane.xlu1 %523 }
 0x391   : > { %v514_v4 = vmin.f32 %v512_v0, %v513_v1  ;;  %v525_v5 = vmax.f32 %v521_v2, %v524_v3 }
 0x393   : > { %v515_v6 = vrot.slane %v514_v4, 2  ;;  %v526_v7 = vrot.slane %v525_v5, 4  ;;  %v534_v8 = vpop.xlane.xlu0 %533 }
 0x394   : > { %v537_v9 = vpop.xlane.xlu1 %536 }
 0x395   : > { %v516_v10 = vmin.f32 %v514_v4, %v515_v6  ;;  %v527_v11 = vmax.f32 %v525_v5, %v526_v7  ;;  %v538_v12 = vmin.f32 %v534_v8, %v537_v9 }
 0x397   : > { %v528_v13 = vrot.slane %v527_v11, 2  ;;  %v539_v14 = vrot.slane %v538_v12, 4  ;;  %v547_v15 = vpop.xlane.xlu0 %546  ;;  %v517_v17 = vrot.slane %v516_v10, 1 }
 0x398   : > { %v550_v16 = vpop.xlane.xlu1 %549 }
 0x399   : > { %v529_v18 = vmax.f32 %v527_v11, %v528_v13  ;;  %v540_v19 = vmin.f32 %v538_v12, %v539_v14  ;;  %v551_v20 = vmax.f32 %v547_v15, %v550_v16  ;;  %v518_v24 = vmin.f32 %v516_v10, %v517_v17 }
 0x39b   : > { %v530_v21 = vrot.slane %v529_v18, 1  ;;  %v541_v22 = vrot.slane %v540_v19, 2  ;;  %v552_v23 = vrot.slane %v551_v20, 4  ;;  %v562_v37 = vsub.f32 %v1077_v51, %v518_v24 }
 0x39c   : > { %v563_v38 = vsub.f32 %v1075_v50, %v518_v24 }
 0x39d   : > { %v531_v25 = vmax.f32 %v529_v18, %v530_v21  ;;  %v553_v26 = vmax.f32 %v551_v20, %v552_v23  ;;  %v542_v28 = vmin.f32 %v540_v19, %v541_v22 }
 0x39f   : > { %v559_v27 = vsub.f32 %v531_v25, %v518_v24  ;;  %v554_v29 = vrot.slane %v553_v26, 2  ;;  %v543_v31 = vrot.slane %v542_v28, 1 }
 0x3a1   : > { %786 = vrcp.f32 %v559_v27  ;;  %v555_v30 = vmax.f32 %v553_v26, %v554_v29  ;;  %v544_v34 = vmin.f32 %v542_v28, %v543_v31 }
 0x3a3   : > { %v556_v32 = vrot.slane %v555_v30, 1 }
 0x3a5   : > { %v557_v33 = vmax.f32 %v555_v30, %v556_v32 }
 0x3a7   : > { %v558_v35 = vsub.f32 %v557_v33, %v544_v34 }
 0x3ab   : > { %v787_v36 = vpop.eup %786 }
 0x3ac   : > { %v561_v39 = vmul.f32 %v787_v36, %v558_v35 }
 0x3ae   : > { %v564_v40 = vmul.f32 %v562_v37, %v561_v39  ;;  %v565_v41 = vmul.f32 %v563_v38, %v561_v39 }
 0x3b0   : > { %v566_v42 = vadd.f32 %v564_v40, %v544_v34  ;;  %v567_v43 = vadd.f32 %v565_v41, %v544_v34 }
 0x3b2   : > { %v568_v44 = vadd.f32 %v566_v42, %v503_v54  ;;  %v569_v45 = vadd.f32 %v567_v43, %v504_v56 }
 0x3b4   : > { %v699_v46 = vmul.f32 -0.5, %v568_v44  ;;  %v700_v47 = vmul.f32 -0.5, %v569_v45 }
 0x3b6   : > { %v574_v48 = vmul.f32 1.442695, %v699_v46  ;;  %v576_v49 = vmul.f32 1.442695, %v700_v47 }
 0x3b8   : > { %788 = vpow2.f32 %v574_v48 }
 0x3b9   : > { %790 = vpow2.f32 %v576_v49 }
 0x3c2   : > { %v789_v52 = vpop.eup %788 }
 0x3c3   : > { %v791_v51 = vpop.eup %790  ;;  %v578_v53 = vadd.f32 1.0, %v789_v52 }
 0x3c4   : > { %v579_v50 = vadd.f32 1.0, %v791_v51 }
 0x3c5   : > { %792 = vrcp.f32 %v578_v53 }
 0x3c6   : > { %794 = vrcp.f32 %v579_v50 }
 0x3cf   : > { %v793_v54 = vpop.eup %792 }
 0x3d0   : > { %v795_v55 = vpop.eup %794  ;;  %584 = vst.msk [vmem:[%s257_s26] sm:$0xff] %vm505_vm10, %v793_v54 }
 0x3d1   : > { %585 = vst.msk [vmem:[%s257_s26 + $0x8] sm:$0xff] %vm505_vm10, %v795_v55 }
 0x3d2   : > { %839 = shalt.err (!%p836_p4)
}
 0x3d3   : > { %s840_s29 = scalar_lea.hbm %s1101_s15, 256  ;;  %s844_s13 = scalar_lea.hbm %s1154_s5, 512 }
 0x3d4   : > { %p841_p5 = scmp.ne.s32.totalorder %s1101_s15, %s840_s29  ;;  %p845_p1 = scmp.lt.u32.totalorder %s1101_s15, %s1154_s5 }
 0x3d5   : > { %p846_p3 = scmp.lt.u32.totalorder %s844_s13, %s840_s29  ;;  %p848_p11 = scmp.lt.u32.totalorder %s840_s29, %s1101_s15 }
 0x3d6   : > { %p842_p7 = pnand %p841_p5, %p1161_p12 }
 0x3d7   : > { %p847_p6 = por %p846_p3, %p845_p1 }
 0x3d8   : > { %p843_p9 = pneg %p842_p7 }
 0x3d9   : > { %p849_p13 = por %p848_p11, %p847_p6 }
 0x3db   : > { %p850_p8 = pnand %p849_p13, %p843_p9 }
 0x3dd   : > { %853 = shalt.err (!%p850_p8)
}
 0x3de   : > { %s908_s26 = smov 128   ;;  %s909_s12 = smov 8  }
 0x3df   : > { %726 = dma.vmem_to_hbm [thread:$0]  (%p1161_p12), %s1103_s28, 256, %s1101_s15, %s587_s16, %s908_s26, %s908_s26, %s909_s12  }
 0x3e0 PF: > { %s615_s14 = sand.u32 1, %s880_s18   ;;  %p1162_p10 = scmp.ne.s32.totalorder %s1159_s6, 0 }
 0x3e1   : > { %p1163_p0 = scmp.ge.s32.totalorder %s892_s21, 2  ;;  %s616_s22 = scalar_lea.sflag [#allocation4], %s615_s14 }
 0x3e3   : > { %p733_p2 = pnand %p1163_p0, %p1162_p10 }
 0x3e5   : > { %875 = dma.done.wait (!%p733_p2), %s616_s22, 256  }
 0x3e6   : > { %877 = vsyncadd (!%p733_p2), %s616_s22, 4294967040  ;;  %p18_p4 = scmp.ge.s32.totalorder %s965_s24, 4   ;;  %s1164_s18 = smov %s884_s19 }
 0x3e7   : > { %s1165_s19 = smov %s888_s20  ;;  %s1166_s20 = smov %s977_s27 }
 0x3e8   : > { %s1167_s21 = smov %s965_s24  ;;  %20 = sbr.rel (!%p18_p4) target bundleno = 5 (0x5), region = 88 }
 0x3ef   :  { %621 = vsyncpa [#allocation3], 1 }
 0x3f0   :  { %623 = vsyncpa [#allocation3 + $0x1], 1 }
 0x3f1   :  { %624 = vsyncpa [#allocation4], 1 }
 0x3f2   :  { %626 = vsyncpa [#allocation4 + $0x1], 1 }

</bundles_post_ra>
